<compile_context>
chip_gen: v6e
topology: v6e:2x2x1
jax: 0.10.0
libtpu: 0.0.40
codegen_flags: <defaults>
</compile_context>

<pallas_src>
import functools

import jax
import jax.numpy as jnp
from jax.experimental import pallas as pl
from jax.experimental.pallas import tpu as pltpu

FP8_DTYPE = jnp.float8_e4m3fn
FP8_MAX = float(jnp.finfo(FP8_DTYPE).max)  # 448.0


# ---------------------------------------------------------------------------
# Kernel
# ---------------------------------------------------------------------------
def _moe_gmm_kernel(block_expert_ref, block_rows_ref,            # scalar prefetch (SMEM)
                    x_ref, xs_ref, gate_ref,                     # per row-block
                    w1_ref, s1_ref, w3_ref, s3_ref, w2_ref, s2_ref,  # per (expert, I-tile)
                    o_ref,                                       # per row-block
                    acc_ref):                                    # VMEM scratch
    del block_expert_ref  # only used inside the index_maps
    b = pl.program_id(0)  # row-block of expert-grouped token rows
    i = pl.program_id(1)  # I-tile (reduction into acc)

    @pl.when(i == 0)
    def _init():
        acc_ref[...] = jnp.zeros_like(acc_ref)

    # Skip blocks that contain only padding rows (no routed tokens).
    @pl.when(block_rows_ref[b] > 0)
    def _compute():
        x = x_ref[...].astype(jnp.bfloat16)         # [tT, H]  fp8 -> bf16 (exact)
        xs = xs_ref[...]                            # [tT, 1]  per-token act scale
        gate_w = gate_ref[...]                      # [tT, 1]  router weight (0 on pads)

        dn = (((1,), (1,)), ((), ()))               # contract last dims; no .T relayout

        w_gate = w1_ref[...].astype(jnp.bfloat16)   # [tI, H]
        w_up = w3_ref[...].astype(jnp.bfloat16)     # [tI, H]
        h_g = jax.lax.dot_general(x, w_gate, dn, preferred_element_type=jnp.float32)
        h_u = jax.lax.dot_general(x, w_up, dn, preferred_element_type=jnp.float32)

        # FP8 dequant: per-token activation scale * per-output-channel weight scale.
        h_g = h_g * xs * s1_ref[...]                # s1: [1, tI]
        h_u = h_u * xs * s3_ref[...]                # s3: [1, tI]

        act = h_g * jax.nn.sigmoid(h_g) * h_u       # silu(gate) * up    [tT, tI]
        act = act * gate_w                          # fold router weight on the I side

        w_down = w2_ref[...].astype(jnp.bfloat16)   # [H, tI]
        y = jax.lax.dot_general(act.astype(jnp.bfloat16), w_down, dn,
                                preferred_element_type=jnp.float32)  # [tT, H]
        acc_ref[...] += y * s2_ref[...]             # s2: [1, H] per-output-channel scale

    @pl.when(i == pl.num_programs(1) - 1)
    def _finalize():
        o_ref[...] = acc_ref[...].astype(o_ref.dtype)


# ---------------------------------------------------------------------------
# Wrapper helpers
# ---------------------------------------------------------------------------
def _round_up(a, b):
    return ((a + b - 1) // b) * b


def _choose_i_tile(intermediate):
    if intermediate <= 1024:
        return intermediate
    for cand in (1024, 512, 256, 128):
        if intermediate % cand == 0:
            return cand
    return intermediate


def _group_assignments(topk_ids, topk_weights, num_local_experts, experts_min, row_tile):
    """Sort (token, k) assignments by local expert and pad each group to row_tile rows."""
    T, K = topk_ids.shape
    A = T * K
    ids = topk_ids.reshape(-1).astype(jnp.int32)
    gates = topk_weights.reshape(-1).astype(jnp.float32)
    tok = jnp.repeat(jnp.arange(T, dtype=jnp.int32), K)

    local = ids - experts_min
    valid = (local >= 0) & (local < num_local_experts)
    gates = jnp.where(valid, gates, 0.0)            # out-of-range experts contribute 0
    local = jnp.clip(local, 0, num_local_experts - 1)

    order = jnp.argsort(local)
    sorted_e = local[order]
    sorted_tok = tok[order]
    sorted_gate = gates[order]

    counts = jnp.bincount(sorted_e, length=num_local_experts).astype(jnp.int32)
    padded = ((counts + row_tile - 1) // row_tile) * row_tile
    group_start = jnp.concatenate(
        [jnp.zeros((1,), jnp.int32), jnp.cumsum(padded)[:-1].astype(jnp.int32)])
    count_start = jnp.concatenate(
        [jnp.zeros((1,), jnp.int32), jnp.cumsum(counts)[:-1].astype(jnp.int32)])

    rank = jnp.arange(A, dtype=jnp.int32) - count_start[sorted_e]
    dest = group_start[sorted_e] + rank             # unique destination row per assignment

    # Static worst-case padded-row count (so shapes stay static under jit).
    R = _round_up(A + num_local_experts * (row_tile - 1), row_tile)
    num_blocks = R // row_tile

    row_token = jnp.full((R,), -1, jnp.int32).at[dest].set(sorted_tok)
    row_gate = jnp.zeros((R,), jnp.float32).at[dest].set(sorted_gate)

    ends = jnp.cumsum(padded).astype(jnp.int32)
    block_expert = jnp.searchsorted(
        ends, jnp.arange(num_blocks, dtype=jnp.int32) * row_tile, side='right')
    block_expert = jnp.minimum(block_expert, num_local_experts - 1).astype(jnp.int32)
    block_rows = jnp.sum((row_token >= 0).reshape(num_blocks, row_tile),
                         axis=1).astype(jnp.int32)
    return row_token, row_gate, block_expert, block_rows, num_blocks, R


def _kernel_supports_fp8():
    """Capability probe: some TPU generations / Mosaic builds lack in-kernel fp8 casts."""
    def probe(x_ref, o_ref):
        o_ref[...] = x_ref[...].astype(jnp.bfloat16)
    try:
        x = jnp.zeros((32, 128), FP8_DTYPE)
        out = pl.pallas_call(
            probe, out_shape=jax.ShapeDtypeStruct((32, 128), jnp.bfloat16))(x)
        jax.block_until_ready(out)
        return True
    except Exception:
        return False


# ---------------------------------------------------------------------------
# Public wrapper
# ---------------------------------------------------------------------------
def mixture_of_experts_fp8_pallas(x, topk_ids, topk_weights,
                                  w13_fp8, w13_scale, w2_fp8, w2_scale,
                                  *, experts_min=0, experts_max=None,
                                  activation="silu", row_tile=32, i_tile=None,
                                  fp8_in_kernel=True):
    assert activation == "silu"
    T, H = x.shape
    E, two_I, H2 = w13_fp8.shape
    assert H2 == H and two_I % 2 == 0
    I = two_I // 2
    assert w2_fp8.shape == (E, H, I)
    if experts_max is None:
        experts_max = experts_min + E - 1
    # Clamp to the experts actually handled here; out-of-range experts never execute.
    E_active = max(1, min(E, experts_max - experts_min + 1))

    tI = _choose_i_tile(I) if i_tile is None else i_tile
    assert I % tI == 0
    n_i = I // tI
    tT = row_tile

    # Per-expert weights in permuted (out, in) layout; split fused gate/up for I tiling.
    w1r = w13_fp8[:E_active, :I, :]                                    # [E, I, H]
    w3r = w13_fp8[:E_active, I:, :]                                    # [E, I, H]
    s1r = w13_scale[:E_active, :I].astype(jnp.float32).reshape(E_active, 1, I)
    s3r = w13_scale[:E_active, I:].astype(jnp.float32).reshape(E_active, 1, I)
    w2r = w2_fp8[:E_active]                                            # [E, H, I]
    s2r = w2_scale[:E_active].astype(jnp.float32).reshape(E_active, 1, H)

    # --- group (token, k) assignments by expert --------------------------------------
    row_token, row_gate, block_expert, block_rows, num_blocks, R = _group_assignments(
        topk_ids, topk_weights, E_active, experts_min, tT)

    # Gather hidden states into expert-sorted order and fp8-quantize per token
    # (matches dynamic_quant: per-row amax / FP8_MAX scale).
    tok_idx = jnp.clip(row_token, 0, T - 1)
    x_rows = jnp.take(x, tok_idx, axis=0).astype(jnp.float32)          # [R, H]
    amax = jnp.max(jnp.abs(x_rows), axis=-1, keepdims=True)
    x_scale = (amax + 1e-8) / FP8_MAX                                  # [R, 1]
    x_q = (x_rows / x_scale).astype(FP8_DTYPE)                         # [R, H]
    row_gate = row_gate[:, None]                                       # [R, 1]

    if fp8_in_kernel:
        x_in, w1_in, w3_in, w2_in = x_q, w1r, w3r, w2r
    else:
        # Fallback for Mosaic builds without in-kernel fp8: ship the already-quantized
        # values as bf16 (e4m3 is exactly representable in bf16 -> identical numerics,
        # only the HBM-bandwidth win is lost).
        x_in = x_q.astype(jnp.bfloat16)
        w1_in = w1r.astype(jnp.bfloat16)
        w3_in = w3r.astype(jnp.bfloat16)
        w2_in = w2r.astype(jnp.bfloat16)

    # Explicit VMEM budget: double-buffered tiles + accumulator + headroom.
    step_bytes = (2 * tI * H + H * tI          # weight tiles (fp8 / bf16)
                  + 2 * (tI + H) * 4           # per-channel scales
                  + tT * H                     # x tile
                  + tT * 2 * 4                 # x_scale + router weight
                  + tT * H * 4)                # output tile (f32)
    vmem_limit = int(min(max(2 * step_bytes + tT * H * 4 + (8 << 20), 32 << 20), 96 << 20))

    grid_spec = pltpu.PrefetchScalarGridSpec(
        num_scalar_prefetch=2,                 # block->expert table, block row counts
        grid=(num_blocks, n_i),
        in_specs=[
            pl.BlockSpec((tT, H), lambda b, i, be, br: (b, 0)),               # x (sorted)
            pl.BlockSpec((tT, 1), lambda b, i, be, br: (b, 0)),               # x scale
            pl.BlockSpec((tT, 1), lambda b, i, be, br: (b, 0)),               # router w
            pl.BlockSpec((None, tI, H), lambda b, i, be, br: (be[b], i, 0)),  # W1 (gate)
            pl.BlockSpec((None, 1, tI), lambda b, i, be, br: (be[b], 0, i)),  # s1
            pl.BlockSpec((None, tI, H), lambda b, i, be, br: (be[b], i, 0)),  # W3 (up)
            pl.BlockSpec((None, 1, tI), lambda b, i, be, br: (be[b], 0, i)),  # s3
            pl.BlockSpec((None, H, tI), lambda b, i, be, br: (be[b], 0, i)),  # W2 (down)
            pl.BlockSpec((None, 1, H), lambda b, i, be, br: (be[b], 0, 0)),   # s2
        ],
        out_specs=pl.BlockSpec((tT, H), lambda b, i, be, br: (b, 0)),
        scratch_shapes=[pltpu.VMEM((tT, H), jnp.float32)],
    )

    y_sorted = pl.pallas_call(
        _moe_gmm_kernel,
        out_shape=jax.ShapeDtypeStruct((R, H), jnp.float32),
        grid_spec=grid_spec,
        compiler_params=pltpu.CompilerParams(
            dimension_semantics=("parallel", "arbitrary"),
            vmem_limit_bytes=vmem_limit),
    )(block_expert, block_rows, x_in, x_scale, row_gate,
      w1_in, s1r, w3_in, s3r, w2_in, s2r)

    # Scatter-add the (already router-weighted) rows back to tokens; pad rows -> bucket T.
    seg = jnp.where(row_token >= 0, row_token, T)
    out = jnp.zeros((T + 1, H), jnp.float32).at[seg].add(y_sorted)[:T]
    return out.astype(x.dtype)


# ---------------------------------------------------------------------------
# Test-side quantization helper + pure-JAX reference
# ---------------------------------------------------------------------------
def quantize_per_channel(w):
    """Per-output-channel fp8(e4m3) quantization of a [..., out, in] weight."""
    amax = jnp.max(jnp.abs(w), axis=-1)
    scale = (amax + 1e-8) / FP8_MAX
    w_q = (w / scale[..., None]).astype(FP8_DTYPE)
    return w_q, scale.astype(jnp.float32)


def _reference(x, topk_ids, topk_weights, w13_fp8, w13_scale, w2_fp8, w2_scale,
               experts_min, experts_max):
    T, H = x.shape
    E, two_I, _ = w13_fp8.shape
    I = two_I // 2
    xf = x.astype(jnp.float32)
    amax = jnp.max(jnp.abs(xf), axis=-1, keepdims=True)
    xs = (amax + 1e-8) / FP8_MAX
    xq = (xf / xs).astype(FP8_DTYPE).astype(jnp.float32) * xs
    w13 = w13_fp8.astype(jnp.float32) * w13_scale.astype(jnp.float32)[..., None]
    w2 = w2_fp8.astype(jnp.float32) * w2_scale.astype(jnp.float32)[..., None]
    out = jnp.zeros((T, H), jnp.float32)
    for e in range(E):
        eg = e + experts_min
        if eg > experts_max:
            continue
        coeff = jnp.sum(jnp.where(topk_ids == eg, topk_weights.astype(jnp.float32), 0.0),
                        axis=-1, keepdims=True)
        h = jnp.dot(xq, w13[e].T, precision=jax.lax.Precision.HIGHEST)
        g, u = h[:, :I], h[:, I:]
        act = g * jax.nn.sigmoid(g) * u
        y = jnp.dot(act, w2[e].T, precision=jax.lax.Precision.HIGHEST)
        out = out + coeff * y
    return out.astype(x.dtype)


if __name__ == "__main__":
    # Small config: 8 tokens, hidden=128, intermediate=64, 8 experts, top-2.
    T, H, I, E, K = 8, 128, 64, 8, 2
    experts_min, experts_max = 0, E - 1

    key = jax.random.PRNGKey(0)
    k1, k2, k3, k4, k5 = jax.random.split(key, 5)

    x = jax.random.normal(k1, (T, H), dtype=jnp.float32)
    w13 = jax.random.normal(k2, (E, 2 * I, H), dtype=jnp.float32) * 0.05
    w2 = jax.random.normal(k3, (E, H, I), dtype=jnp.float32) * 0.05

    topk_ids = jax.random.randint(k4, (T, K), 0, E, dtype=jnp.int32)
    rw = jax.random.uniform(k5, (T, K), dtype=jnp.float32) + 0.1
    topk_weights = rw / jnp.sum(rw, axis=-1, keepdims=True)

    # FP8 per-output-channel weights + scales (what MoeFP8Matmul holds).
    w13_fp8, w13_scale = quantize_per_channel(w13)
    w2_fp8, w2_scale = quantize_per_channel(w2)

    fp8_ok = _kernel_supports_fp8()
    moe = jax.jit(functools.partial(
        mixture_of_experts_fp8_pallas,
        experts_min=experts_min, experts_max=experts_max, activation="silu",
        fp8_in_kernel=fp8_ok))

    out = jax.block_until_ready(
        moe(x, topk_ids, topk_weights, w13_fp8, w13_scale, w2_fp8, w2_scale))

    ref = _reference(x, topk_ids, topk_weights, w13_fp8, w13_scale, w2_fp8, w2_scale,
                     experts_min, experts_max)

    assert out.shape == (T, H)
    assert bool(jnp.all(jnp.isfinite(out)))
    assert jnp.allclose(out, ref, atol=1e-2, rtol=1e-2), (
        f"mismatch vs reference, max abs err {float(jnp.max(jnp.abs(out - ref)))}")
    print("KERNEL_OK")
</pallas_src>

<mosaic_0001>
module attributes {stable_mosaic.version = 11 : i64} {
  func.func @probe(%arg0: memref<32x128xf8E4M3FN, #tpu.memory_space<vmem>>, %arg1: memref<32x128xbf16, #tpu.memory_space<vmem>>) attributes {dimension_semantics = [], scalar_prefetch = 0 : i64, scratch_operands = 0 : i64, tpu.core_type = #tpu.core_type<tc>} {
    %c0 = arith.constant 0 : index
    %c0_0 = arith.constant 0 : index
    %0 = vector.load %arg0[%c0, %c0_0] : memref<32x128xf8E4M3FN, #tpu.memory_space<vmem>>, vector<32x128xf8E4M3FN>
    %1 = arith.extf %0 : vector<32x128xf8E4M3FN> to vector<32x128xbf16>
    %c0_1 = arith.constant 0 : index
    %c0_2 = arith.constant 0 : index
    %2 = vector.load %arg1[%c0_1, %c0_2] : memref<32x128xbf16, #tpu.memory_space<vmem>>, vector<32x128xbf16>
    tpu.vector_store %arg1[%c0_1, %c0_2], %1 {strides = array<i32>} : memref<32x128xbf16, #tpu.memory_space<vmem>>, vector<32x128xbf16>,
    return
  }
}

module attributes {stable_mosaic.version = 11 : i64} {
  func.func private @main(%arg0: i32) attributes {dimension_semantics = [#tpu.dimension_semantics<core_parallel>], iteration_bounds = array<i64: 2>, tpu.core_type = #tpu.core_type<sc_scalar_subcore>, window_params = []} {
    return
  }
}

module attributes {stable_mosaic.version = 11 : i64} {
  func.func private @main(%arg0: i32) attributes {dimension_semantics = [#tpu.dimension_semantics<core_parallel>], iteration_bounds = array<i64: 2>, tpu.core_type = #tpu.core_type<sc_scalar_subcore>, window_params = []} {
    return
  }
}

module attributes {stable_mosaic.version = 11 : i64} {
  func.func @_moe_gmm_kernel(%arg0: i32, %arg1: i32, %arg2: memref<9xi32, #tpu.memory_space<smem>>, %arg3: memref<9xi32, #tpu.memory_space<smem>>, %arg4: memref<32x128xbf16, #tpu.memory_space<vmem>>, %arg5: memref<32x1xf32, #tpu.memory_space<vmem>>, %arg6: memref<32x1xf32, #tpu.memory_space<vmem>>, %arg7: memref<1x64x128xbf16, #tpu.memory_space<vmem>>, %arg8: memref<1x1x64xf32, #tpu.memory_space<vmem>>, %arg9: memref<1x64x128xbf16, #tpu.memory_space<vmem>>, %arg10: memref<1x1x64xf32, #tpu.memory_space<vmem>>, %arg11: memref<1x128x64xbf16, #tpu.memory_space<vmem>>, %arg12: memref<1x1x128xf32, #tpu.memory_space<vmem>>, %arg13: memref<32x128xf32, #tpu.memory_space<vmem>>, %arg14: memref<32x128xf32, #tpu.memory_space<vmem>>) attributes {dimension_semantics = [#tpu.dimension_semantics<parallel>, #tpu.dimension_semantics<arbitrary>], iteration_bounds = array<i64: 9, 1>, scalar_prefetch = 2 : i64, scratch_operands = 1 : i64, tpu.core_type = #tpu.core_type<tc>, window_params = [{transform_indices = @transform_0, window_bounds = array<i64: 32, 128>}, {transform_indices = @transform_1, window_bounds = array<i64: 32, 1>}, {transform_indices = @transform_2, window_bounds = array<i64: 32, 1>}, {transform_indices = @transform_3, window_bounds = array<i64: 1, 64, 128>}, {transform_indices = @transform_4, window_bounds = array<i64: 1, 1, 64>}, {transform_indices = @transform_5, window_bounds = array<i64: 1, 64, 128>}, {transform_indices = @transform_6, window_bounds = array<i64: 1, 1, 64>}, {transform_indices = @transform_7, window_bounds = array<i64: 1, 128, 64>}, {transform_indices = @transform_8, window_bounds = array<i64: 1, 1, 128>}, {transform_indices = @transform_9, window_bounds = array<i64: 32, 128>}]} {
    %c0_i32 = arith.constant 0 : i32
    %0 = arith.cmpi eq, %arg1, %c0_i32 : i32
    %1 = arith.extui %0 : i1 to i32
    %c0_i32_0 = arith.constant 0 : i32
    %2 = arith.cmpi ne, %1, %c0_i32_0 : i32
    scf.if %2 {
      %cst = arith.constant 0.000000e+00 : f32
      %11 = vector.broadcast %cst : f32 to vector<32x128xf32>
      %c0 = arith.constant 0 : index
      %c0_5 = arith.constant 0 : index
      %12 = vector.load %arg14[%c0, %c0_5] : memref<32x128xf32, #tpu.memory_space<vmem>>, vector<32x128xf32>
      tpu.vector_store %arg14[%c0, %c0_5], %11 {strides = array<i32>} : memref<32x128xf32, #tpu.memory_space<vmem>>, vector<32x128xf32>,
    } else {
    }
    %3 = arith.index_cast %arg0 : i32 to index
    %4 = memref.load %arg3[%3] : memref<9xi32, #tpu.memory_space<smem>>
    %c0_i32_1 = arith.constant 0 : i32
    %5 = arith.cmpi sgt, %4, %c0_i32_1 : i32
    %6 = arith.extui %5 : i1 to i32
    %c0_i32_2 = arith.constant 0 : i32
    %7 = arith.cmpi ne, %6, %c0_i32_2 : i32
    scf.if %7 {
      %c0 = arith.constant 0 : index
      %c0_5 = arith.constant 0 : index
      %11 = vector.load %arg4[%c0, %c0_5] : memref<32x128xbf16, #tpu.memory_space<vmem>>, vector<32x128xbf16>
      %c0_6 = arith.constant 0 : index
      %c0_7 = arith.constant 0 : index
      %12 = vector.load %arg5[%c0_6, %c0_7] : memref<32x1xf32, #tpu.memory_space<vmem>>, vector<32x1xf32>
      %c0_8 = arith.constant 0 : index
      %c0_9 = arith.constant 0 : index
      %13 = vector.load %arg6[%c0_8, %c0_9] : memref<32x1xf32, #tpu.memory_space<vmem>>, vector<32x1xf32>
      %c0_10 = arith.constant 0 : index
      %c0_11 = arith.constant 0 : index
      %c0_12 = arith.constant 0 : index
      %14 = vector.load %arg7[%c0_10, %c0_11, %c0_12] : memref<1x64x128xbf16, #tpu.memory_space<vmem>>, vector<1x64x128xbf16>
      %15 = vector.shape_cast %14 : vector<1x64x128xbf16> to vector<64x128xbf16>
      %c0_13 = arith.constant 0 : index
      %c0_14 = arith.constant 0 : index
      %c0_15 = arith.constant 0 : index
      %16 = vector.load %arg9[%c0_13, %c0_14, %c0_15] : memref<1x64x128xbf16, #tpu.memory_space<vmem>>, vector<1x64x128xbf16>
      %17 = vector.shape_cast %16 : vector<1x64x128xbf16> to vector<64x128xbf16>
      %cst = arith.constant dense<0.000000e+00> : vector<32x64xf32>
      %18 = tpu.matmul %11, %15, %cst {dimension_numbers = #tpu.dot_dimension_numbers<[1], [1], [0], [0], [0, 0, 1, 0], [], []>} : vector<32x128xbf16>, vector<64x128xbf16>, vector<32x64xf32> -> vector<32x64xf32>
      %cst_16 = arith.constant dense<0.000000e+00> : vector<32x64xf32>
      %19 = tpu.matmul %11, %17, %cst_16 {dimension_numbers = #tpu.dot_dimension_numbers<[1], [1], [0], [0], [0, 0, 1, 0], [], []>} : vector<32x128xbf16>, vector<64x128xbf16>, vector<32x64xf32> -> vector<32x64xf32>
      %20 = vector.broadcast %12 : vector<32x1xf32> to vector<32x64xf32>
      %21 = arith.mulf %18, %20 : vector<32x64xf32>
      %c0_17 = arith.constant 0 : index
      %c0_18 = arith.constant 0 : index
      %c0_19 = arith.constant 0 : index
      %22 = vector.load %arg8[%c0_17, %c0_18, %c0_19] : memref<1x1x64xf32, #tpu.memory_space<vmem>>, vector<1x1x64xf32>
      %23 = vector.shape_cast %22 : vector<1x1x64xf32> to vector<1x64xf32>
      %24 = vector.broadcast %23 : vector<1x64xf32> to vector<32x64xf32>
      %25 = arith.mulf %21, %24 : vector<32x64xf32>
      %26 = vector.broadcast %12 : vector<32x1xf32> to vector<32x64xf32>
      %27 = arith.mulf %19, %26 : vector<32x64xf32>
      %c0_20 = arith.constant 0 : index
      %c0_21 = arith.constant 0 : index
      %c0_22 = arith.constant 0 : index
      %28 = vector.load %arg10[%c0_20, %c0_21, %c0_22] : memref<1x1x64xf32, #tpu.memory_space<vmem>>, vector<1x1x64xf32>
      %29 = vector.shape_cast %28 : vector<1x1x64xf32> to vector<1x64xf32>
      %30 = vector.broadcast %29 : vector<1x64xf32> to vector<32x64xf32>
      %31 = arith.mulf %27, %30 : vector<32x64xf32>
      %32 = arith.negf %25 : vector<32x64xf32>
      %33 = math.exp %32 : vector<32x64xf32>
      %cst_23 = arith.constant 1.000000e+00 : f32
      %34 = vector.broadcast %cst_23 : f32 to vector<32x64xf32>
      %35 = arith.addf %34, %33 : vector<32x64xf32>
      %36 = arith.divf %34, %35 : vector<32x64xf32>
      %37 = arith.mulf %25, %36 : vector<32x64xf32>
      %38 = arith.mulf %37, %31 : vector<32x64xf32>
      %39 = vector.broadcast %13 : vector<32x1xf32> to vector<32x64xf32>
      %40 = arith.mulf %38, %39 : vector<32x64xf32>
      %c0_24 = arith.constant 0 : index
      %c0_25 = arith.constant 0 : index
      %c0_26 = arith.constant 0 : index
      %41 = vector.load %arg11[%c0_24, %c0_25, %c0_26] : memref<1x128x64xbf16, #tpu.memory_space<vmem>>, vector<1x128x64xbf16>
      %42 = vector.shape_cast %41 : vector<1x128x64xbf16> to vector<128x64xbf16>
      %43 = arith.truncf %40 : vector<32x64xf32> to vector<32x64xbf16>
      %cst_27 = arith.constant dense<0.000000e+00> : vector<32x128xf32>
      %44 = tpu.matmul %43, %42, %cst_27 {dimension_numbers = #tpu.dot_dimension_numbers<[1], [1], [0], [0], [0, 0, 1, 0], [], []>} : vector<32x64xbf16>, vector<128x64xbf16>, vector<32x128xf32> -> vector<32x128xf32>
      %c0_28 = arith.constant 0 : index
      %c0_29 = arith.constant 0 : index
      %45 = vector.load %arg14[%c0_28, %c0_29] : memref<32x128xf32, #tpu.memory_space<vmem>>, vector<32x128xf32>
      %c0_30 = arith.constant 0 : index
      %c0_31 = arith.constant 0 : index
      %c0_32 = arith.constant 0 : index
      %46 = vector.load %arg12[%c0_30, %c0_31, %c0_32] : memref<1x1x128xf32, #tpu.memory_space<vmem>>, vector<1x1x128xf32>
      %47 = vector.shape_cast %46 : vector<1x1x128xf32> to vector<1x128xf32>
      %48 = vector.broadcast %47 : vector<1x128xf32> to vector<32x128xf32>
      %49 = arith.mulf %44, %48 : vector<32x128xf32>
      %50 = arith.addf %45, %49 : vector<32x128xf32>
      %c0_33 = arith.constant 0 : index
      %c0_34 = arith.constant 0 : index
      %51 = vector.load %arg14[%c0_33, %c0_34] : memref<32x128xf32, #tpu.memory_space<vmem>>, vector<32x128xf32>
      tpu.vector_store %arg14[%c0_33, %c0_34], %50 {strides = array<i32>} : memref<32x128xf32, #tpu.memory_space<vmem>>, vector<32x128xf32>,
    } else {
    }
    %c0_i32_3 = arith.constant 0 : i32
    %8 = arith.cmpi eq, %arg1, %c0_i32_3 : i32
    %9 = arith.extui %8 : i1 to i32
    %c0_i32_4 = arith.constant 0 : i32
    %10 = arith.cmpi ne, %9, %c0_i32_4 : i32
    scf.if %10 {
      %c0 = arith.constant 0 : index
      %c0_5 = arith.constant 0 : index
      %11 = vector.load %arg14[%c0, %c0_5] : memref<32x128xf32, #tpu.memory_space<vmem>>, vector<32x128xf32>
      %c0_6 = arith.constant 0 : index
      %c0_7 = arith.constant 0 : index
      %12 = vector.load %arg13[%c0_6, %c0_7] : memref<32x128xf32, #tpu.memory_space<vmem>>, vector<32x128xf32>
      tpu.vector_store %arg13[%c0_6, %c0_7], %11 {strides = array<i32>} : memref<32x128xf32, #tpu.memory_space<vmem>>, vector<32x128xf32>,
    } else {
    }
    return
  }
  func.func @transform_0(%arg0: i32, %arg1: i32, %arg2: memref<9xi32, #tpu.memory_space<smem>>, %arg3: memref<9xi32, #tpu.memory_space<smem>>) -> (i32, i32) {
    %c0_i32 = arith.constant 0 : i32
    %c0_i32_0 = arith.constant 0 : i32
    return %arg0, %c0_i32 : i32, i32
  }
  func.func @transform_1(%arg0: i32, %arg1: i32, %arg2: memref<9xi32, #tpu.memory_space<smem>>, %arg3: memref<9xi32, #tpu.memory_space<smem>>) -> (i32, i32) {
    %c0_i32 = arith.constant 0 : i32
    %c0_i32_0 = arith.constant 0 : i32
    return %arg0, %c0_i32 : i32, i32
  }
  func.func @transform_2(%arg0: i32, %arg1: i32, %arg2: memref<9xi32, #tpu.memory_space<smem>>, %arg3: memref<9xi32, #tpu.memory_space<smem>>) -> (i32, i32) {
    %c0_i32 = arith.constant 0 : i32
    %c0_i32_0 = arith.constant 0 : i32
    return %arg0, %c0_i32 : i32, i32
  }
  func.func @transform_3(%arg0: i32, %arg1: i32, %arg2: memref<9xi32, #tpu.memory_space<smem>>, %arg3: memref<9xi32, #tpu.memory_space<smem>>) -> (i32, i32, i32) {
    %0 = arith.index_cast %arg0 : i32 to index
    %1 = memref.load %arg2[%0] : memref<9xi32, #tpu.memory_space<smem>>
    %c0_i32 = arith.constant 0 : i32
    %c0_i32_0 = arith.constant 0 : i32
    return %1, %arg1, %c0_i32 : i32, i32, i32
  }
  func.func @transform_4(%arg0: i32, %arg1: i32, %arg2: memref<9xi32, #tpu.memory_space<smem>>, %arg3: memref<9xi32, #tpu.memory_space<smem>>) -> (i32, i32, i32) {
    %0 = arith.index_cast %arg0 : i32 to index
    %1 = memref.load %arg2[%0] : memref<9xi32, #tpu.memory_space<smem>>
    %c0_i32 = arith.constant 0 : i32
    %c0_i32_0 = arith.constant 0 : i32
    return %1, %c0_i32, %arg1 : i32, i32, i32
  }
  func.func @transform_5(%arg0: i32, %arg1: i32, %arg2: memref<9xi32, #tpu.memory_space<smem>>, %arg3: memref<9xi32, #tpu.memory_space<smem>>) -> (i32, i32, i32) {
    %0 = arith.index_cast %arg0 : i32 to index
    %1 = memref.load %arg2[%0] : memref<9xi32, #tpu.memory_space<smem>>
    %c0_i32 = arith.constant 0 : i32
    %c0_i32_0 = arith.constant 0 : i32
    return %1, %arg1, %c0_i32 : i32, i32, i32
  }
  func.func @transform_6(%arg0: i32, %arg1: i32, %arg2: memref<9xi32, #tpu.memory_space<smem>>, %arg3: memref<9xi32, #tpu.memory_space<smem>>) -> (i32, i32, i32) {
    %0 = arith.index_cast %arg0 : i32 to index
    %1 = memref.load %arg2[%0] : memref<9xi32, #tpu.memory_space<smem>>
    %c0_i32 = arith.constant 0 : i32
    %c0_i32_0 = arith.constant 0 : i32
    return %1, %c0_i32, %arg1 : i32, i32, i32
  }
  func.func @transform_7(%arg0: i32, %arg1: i32, %arg2: memref<9xi32, #tpu.memory_space<smem>>, %arg3: memref<9xi32, #tpu.memory_space<smem>>) -> (i32, i32, i32) {
    %0 = arith.index_cast %arg0 : i32 to index
    %1 = memref.load %arg2[%0] : memref<9xi32, #tpu.memory_space<smem>>
    %c0_i32 = arith.constant 0 : i32
    %c0_i32_0 = arith.constant 0 : i32
    return %1, %c0_i32, %arg1 : i32, i32, i32
  }
  func.func @transform_8(%arg0: i32, %arg1: i32, %arg2: memref<9xi32, #tpu.memory_space<smem>>, %arg3: memref<9xi32, #tpu.memory_space<smem>>) -> (i32, i32, i32) {
    %0 = arith.index_cast %arg0 : i32 to index
    %1 = memref.load %arg2[%0] : memref<9xi32, #tpu.memory_space<smem>>
    %c0_i32 = arith.constant 0 : i32
    %c0_i32_0 = arith.constant 0 : i32
    %c0_i32_1 = arith.constant 0 : i32
    return %1, %c0_i32, %c0_i32_0 : i32, i32, i32
  }
  func.func @transform_9(%arg0: i32, %arg1: i32, %arg2: memref<9xi32, #tpu.memory_space<smem>>, %arg3: memref<9xi32, #tpu.memory_space<smem>>) -> (i32, i32) {
    %c0_i32 = arith.constant 0 : i32
    %c0_i32_0 = arith.constant 0 : i32
    return %arg0, %c0_i32 : i32, i32
  }
}

</mosaic_0001>

<bundles_post_ra>
// kernel: tpu_custom_call.1
= control target key start
LH: loop header
LB: loop body
LE: loop exit
PB: predicated region body
PF: predicated region fallthrough
CT: control target
= control target key end

     0   :  { %6 = vsyncpa [#allocation3], 0  ;;  %s281_s0 = inlined_call_operand.hbm [shape: f8e4m3fn[32,128], index: 0, kind: input, shape index: {}]   ;;  %s282_s1 = inlined_call_operand.hbm [shape: bf16[32,128], index: 1, kind: output, shape index: {}]  }
   0x1   :  { %7 = vsyncpa [#allocation4], 0  ;;  %s249_s6 = smov [#allocation2]  }
   0x2   :  { %s14_s7 = sshll.u32 %s249_s6, 4  ;;  %s15_s7 = int_to_ptr.vmem [resolvable:$true] %s14_s7 }
   0x3   :  { %s213_s8 = scalar_lea.vmem %s15_s7, 128  ;;  %p218_p1 = scmp.lt.s32.totalorder %s15_s7, %s15_s7 }
   0x4   :  { %p214_p0 = scmp.ne.s32.totalorder %s15_s7, %s213_s8  ;;  %p219_p2 = scmp.lt.s32.totalorder %s213_s8, %s213_s8 }
   0x6   :  { %p220_p3 = por %p219_p2, %p218_p1 }
   0x8   :  { %p221_p4 = pnand %p220_p3, %p214_p0 }
   0xa   :  { %224 = shalt.err (!%p221_p4)
}
   0xb   :  { %17 = dma.hbm_to_vmem [thread:$0]  %s281_s0, 128, %s15_s7, [#allocation3]  }
   0xc   :  { %245 = dma.done.wait [#allocation3], 128  }
   0xd   :  { %246 = vsyncadd [#allocation3], 4294967168  ;;  %v21_v0 = vld [vmem:[#allocation2] sm:$0xff] }
   0xe   :  { %22 = vst [vmem:[#allocation6] sm:$0xff] %v21_v0 }
  0x15   :  { %v23_v1 = vld [vmem:[#allocation6] sm:$0x3] }
  0x16   :  { %v24_v2 = vunpack.c.0.f8e4m3b11 %v23_v1 }
  0x18   :  { %v28_v3 = vand.u32 2147483647, %v24_v2  ;;  %vm30_vm0 = vcmp.ne.f32.partialorder %v24_v2, %v24_v2  ;;  %v31_v4 = vmul.f32 16.0, %v24_v2 }
  0x1a   :  { %vm266_vm1 = vcmp.gt.f32.partialorder %v28_v3, 29.0  ;;  %v32_v6 = vsel %vm30_vm0, -0.0, %v31_v4 }
  0x1b   :  { %v33_v7 = vsel %vm266_vm1, nan, %v32_v6 }
  0x1c   :  { %52 = vst [vmem:[#allocation7] sm:$0xff] %v21_v0 }
  0x23   :  { %v54_v8 = vld [vmem:[#allocation7 + $0x2] sm:$0x3] }
  0x24   :  { %v55_v9 = vunpack.c.0.f8e4m3b11 %v54_v8 }
  0x26   :  { %v59_v10 = vand.u32 2147483647, %v55_v9  ;;  %vm61_vm2 = vcmp.ne.f32.partialorder %v55_v9, %v55_v9  ;;  %v62_v11 = vmul.f32 16.0, %v55_v9 }
  0x28   :  { %vm272_vm3 = vcmp.gt.f32.partialorder %v59_v10, 29.0  ;;  %v63_v13 = vsel %vm61_vm2, -0.0, %v62_v11 }
  0x29   :  { %v64_v14 = vsel %vm272_vm3, nan, %v63_v13 }
  0x2a   :  { %83 = vst [vmem:[#allocation8] sm:$0xff] %v21_v0 }
  0x31   :  { %v85_v15 = vld [vmem:[#allocation8 + $0x4] sm:$0x3] }
  0x32   :  { %v86_v16 = vunpack.c.0.f8e4m3b11 %v85_v15 }
  0x34   :  { %v90_v17 = vand.u32 2147483647, %v86_v16  ;;  %vm92_vm4 = vcmp.ne.f32.partialorder %v86_v16, %v86_v16  ;;  %v93_v18 = vmul.f32 16.0, %v86_v16 }
  0x36   :  { %vm91_vm5 = vcmp.gt.f32.partialorder %v90_v17, 29.0  ;;  %v94_v19 = vsel %vm92_vm4, -0.0, %v93_v18 }
  0x37   :  { %v95_v20 = vsel %vm91_vm5, nan, %v94_v19 }
  0x38   :  { %114 = vst [vmem:[#allocation9] sm:$0xff] %v21_v0  ;;  %v193_v27 = vpack.c.bf16 %v64_v14, %v33_v7  ;;  %s250_s0 = smov [#allocation5]  }
  0x39   :  { %s170_s11 = sshll.u32 %s250_s0, 4  ;;  %s171_s11 = int_to_ptr.vmem [resolvable:$true] %s170_s11 }
  0x3a   :  { %194 = vst [vmem:[#allocation5] sm:$0xff] %v193_v27   ;;  %s225_s12 = scalar_lea.vmem %s171_s11, 256  ;;  %p230_p6 = scmp.lt.s32.totalorder %s171_s11, %s171_s11 }
  0x3b   :  { %p226_p5 = scmp.ne.s32.totalorder %s171_s11, %s225_s12  ;;  %p231_p7 = scmp.lt.s32.totalorder %s225_s12, %s225_s12 }
  0x3d   :  { %p232_p8 = por %p231_p7, %p230_p6 }
  0x3f   :  { %v116_v21 = vld [vmem:[#allocation9 + $0x6] sm:$0x3]  ;;  %p233_p9 = pnand %p232_p8, %p226_p5 }
  0x40   :  { %v117_v22 = vunpack.c.0.f8e4m3b11 %v116_v21 }
  0x42   :  { %v121_v23 = vand.u32 2147483647, %v117_v22  ;;  %vm123_vm6 = vcmp.ne.f32.partialorder %v117_v22, %v117_v22  ;;  %v124_v24 = vmul.f32 16.0, %v117_v22 }
  0x44   :  { %vm122_vm7 = vcmp.gt.f32.partialorder %v121_v23, 29.0  ;;  %v125_v25 = vsel %vm123_vm6, -0.0, %v124_v24 }
  0x45   :  { %v126_v26 = vsel %vm122_vm7, nan, %v125_v25 }
  0x46   :  { %v198_v28 = vpack.c.bf16 %v126_v26, %v95_v20 }
  0x48   :  { %200 = vst [vmem:[#allocation5 + $0x8] sm:$0xff] %v198_v28  }
  0x49   :  { %236 = shalt.err (!%p233_p9)
}
  0x4a   :  { %s251_s13 = smov 64   ;;  %s252_s14 = smov 4  }
  0x4b   :  { %176 = dma.vmem_to_hbm [thread:$0]  %s171_s11, 256, %s282_s1, [#allocation4], %s251_s13, %s251_s13, %s252_s14  }
  0x4c   :  { %247 = dma.done.wait [#allocation4], 256  }
  0x4d   :  { %248 = vsyncadd [#allocation4], 4294967040 }
  0x4e   :  { %180 = vsyncpa [#allocation3], 1 }
  0x4f   :  { %181 = vsyncpa [#allocation4], 1 }

// kernel: custom-call.1
= control target key start
LH: loop header
LB: loop body
LE: loop exit
PB: predicated region body
PF: predicated region fallthrough
CT: control target
= control target key end

     0   :  { %s6_s0 = inlined_call_operand.vmem [shape: u32[9], index: 0, kind: output, shape index: {}]  }

// kernel: mixture_of_experts_fp8_pallas.1
= control target key start
LH: loop header
LB: loop body
LE: loop exit
PB: predicated region body
PF: predicated region fallthrough
CT: control target
= control target key end

     0   :  { %s1730_s0 = inlined_call_operand.vmem [shape: s32[9], index: 0, kind: input, shape index: {}]   ;;  %s1731_s2 = inlined_call_operand.vmem [shape: bf16[288,128], index: 2, kind: input, shape index: {}]   ;;  %s1732_s3 = inlined_call_operand.vmem [shape: f32[288,1], index: 3, kind: input, shape index: {}]   ;;  %s1733_s4 = inlined_call_operand.vmem [shape: f32[288,1], index: 4, kind: input, shape index: {}]   ;;  %s1734_s5 = inlined_call_operand.vmem [shape: bf16[8,64,128], index: 5, kind: input, shape index: {}]   ;;  %s1735_s6 = inlined_call_operand.vmem [shape: f32[8,1,64], index: 6, kind: input, shape index: {}]   ;;  %s1736_s7 = inlined_call_operand.vmem [shape: bf16[8,64,128], index: 7, kind: input, shape index: {}]   ;;  %s1737_s8 = inlined_call_operand.vmem [shape: f32[8,1,64], index: 8, kind: input, shape index: {}]   ;;  %s1738_s9 = inlined_call_operand.vmem [shape: bf16[8,128,64], index: 9, kind: input, shape index: {}]   ;;  %s1739_s10 = inlined_call_operand.vmem [shape: f32[8,1,128], index: 10, kind: input, shape index: {}]   ;;  %s1740_s11 = inlined_call_operand.vmem [shape: f32[288,128], index: 11, kind: output, shape index: {}]   ;;  %s1741_s1 = inlined_call_operand.vmem [shape: s32[9], index: 1, kind: input, shape index: {}]  }
   0x1   :  { %1743 = sst [smem:[#allocation9_spill]] %s1731_s2  ;;  %s16_s19 = sshll.u32 %s1730_s0, 4  ;;  %s17_s19 = int_to_ptr.vmem [resolvable:$true] %s16_s19 }
   0x2   :  { %1744 = sst [smem:[#allocation10_spill]] %s1732_s3  ;;  %s20_s22 = sshll.u32 %s1741_s1, 4  ;;  %s21_s22 = int_to_ptr.vmem [resolvable:$true] %s20_s22 }
   0x3   :  { %1745 = sst [smem:[#allocation11_spill]] %s1733_s4  ;;  %s1457_s23 = scalar_lea.vmem %s17_s19, 16 }
   0x4   :  { %1746 = sst [smem:[#allocation12_spill]] %s1734_s5  ;;  %p1458_p0 = scmp.ne.s32.totalorder %s17_s19, %s1457_s23 }
   0x5   :  { %p1462_p1 = scmp.lt.s32.totalorder %s17_s19, %s17_s19  ;;  %p1463_p2 = scmp.lt.s32.totalorder %s1457_s23, %s1457_s23 }
   0x7   :  { %p1464_p3 = por %p1463_p2, %p1462_p1 }
   0x9   :  { %p1465_p4 = pnand %p1464_p3, %p1458_p0 }
   0xb   :  { %1468 = shalt.err (!%p1465_p4)  }
   0xc   :  { %s1507_s24 = smov [#allocation4]   ;;  %s1469_s25 = scalar_lea.vmem %s21_s22, 16 }
   0xd   :  { %19 = dma.vmem_to_smem %s17_s19, 16, %s1507_s24, [#allocation3] }
   0xe   :  { %p1470_p5 = scmp.ne.s32.totalorder %s21_s22, %s1469_s25  ;;  %p1474_p6 = scmp.lt.s32.totalorder %s21_s22, %s21_s22 }
   0xf   :  { %p1475_p7 = scmp.lt.s32.totalorder %s1469_s25, %s1469_s25 }
  0x11   :  { %p1476_p8 = por %p1475_p7, %p1474_p6 }
  0x13   :  { %p1477_p9 = pnand %p1476_p8, %p1470_p5 }
  0x15   :  { %1480 = shalt.err (!%p1477_p9)  }
  0x16   :  { %s1508_s0 = smov [#allocation5]  }
  0x17   :  { %23 = dma.vmem_to_smem %s21_s22, 16, %s1508_s0, [#allocation3] }
  0x18   :  { %1493 = dma.done.wait [#allocation3], 32 }
  0x19   :  { %1494 = vsyncadd [#allocation3], 4294967264 }
  0x1a   :  { %25 = sfence }
  0x1b   :  { %s1577_s1 = smov 0   ;;  %s1579_s26 = smov 0  }
  0x1c   :  { %s1581_s27 = smov 0  }
  0x1d LB: > { %1747 = sst [smem:[#allocation7_spill]] %s1501_s26  ;;  %s43_s28 = sadd.s32 1, %s1501_s26  ;;  %s1505_s27 = sphi %s1581_s27, %s31_s27   ;;  %s1501_s26 = sphi %s1579_s26, %s1755_s26   ;;  %s1497_s1 = sphi %s1577_s1, %s1754_s1  }
  0x1e   : > { %p1271_p10 = scmp.ge.s32.totalorder %s1505_s27, 1  ;;  %p45_p11 = scmp.ge.s32.totalorder %s43_s28, 9 }
  0x1f   : > { %p441_p12 = scmp.lt.s32.totalorder %s1505_s27, 10 }
  0x20   : > { %s1757_s28 = smov (%p45_p11, %s43_s28), 0 }
  0x21   : > { %1748 = sst [smem:[#allocation8_spill]] %s1757_s28  ;;  %p442_p13 = pnand %p1271_p10, %p441_p12 }
  0x22   : > { %s1272_s29 = sshll.u32 (!%p442_p13), %s1497_s1, 2  ;;  %s552_s30 = sld [smem:[#allocation4 + %s1497_s1]] (!%p442_p13) }
  0x23   : > { %445 = sbr.rel (%p442_p13) target bundleno = 555 (0x22b), region = 56  ;;  %p535_p0 = scmp.lt.s32.totalorder (!%p442_p13), %s1272_s29, 35 }
  0x24   : > { %s564_s12 = sld [smem:[#allocation4 + %s1497_s1]] (!%p442_p13) }
  0x25   : > { %s572_s13 = sld [smem:[#allocation4 + %s1497_s1]] (!%p442_p13) }
  0x26   : > { %s584_s14 = sld [smem:[#allocation4 + %s1497_s1]] (!%p442_p13) }
  0x27   : > { %s1749_s2 = sld [smem:[#allocation9_spill]] (!%p442_p13) }
  0x28   : > { %v1509_v0 = vmov 0.0   ;;  %s1759_s29 = smov (!%p535_p0, %s1272_s29), 35  ;;  %s1750_s3 = sld [smem:[#allocation10_spill]] }
  0x29   : > { %618 = vst [vmem:[#allocation2 + $0x10] sm:$0xff] %v1509_v0  ;;  %619 = vst [vmem:[#allocation2] sm:$0xff] %v1509_v0  ;;  %s1273_s15 = sshll.u32 %s1759_s29, 2  ;;  %s1275_s16 = sshll.u32 %s1759_s29, 3 }
  0x2a   : > { %620 = vst [vmem:[#allocation2 + $0x18] sm:$0xff] %v1509_v0  ;;  %621 = vst [vmem:[#allocation2 + $0x8] sm:$0xff] %v1509_v0  ;;  %s1751_s4 = sld [smem:[#allocation11_spill]]  ;;  %p554_p1 = scmp.lt.s32.totalorder %s552_s30, 7 }
  0x2b   : > { %p565_p2 = scmp.lt.s32.totalorder %s564_s12, 7  ;;  %p574_p3 = scmp.lt.s32.totalorder %s572_s13, 7 }
  0x2c   : > { %s1761_s30 = smov (!%p554_p1, %s552_s30), 7  ;;  %p585_p4 = scmp.lt.s32.totalorder %s584_s14, 7 }
  0x2d   : > { %s1605_s19 = scalar_lea.vmem %s1749_s2, %s1273_s15  ;;  %s1763_s12 = smov (!%p565_p2, %s564_s12), 7 }
  0x2e   : > { %s1610_s22 = scalar_lea.vmem %s1750_s3, %s1275_s16  ;;  %s1316_s0 = sshll.u32 %s1761_s30, 5 }
  0x2f   : > { %s1752_s5 = sld [smem:[#allocation12_spill]]  ;;  %s1765_s13 = smov (!%p574_p3, %s572_s13), 7 }
  0x30   : > { %s1615_s25 = scalar_lea.vmem %s1751_s4, %s1275_s16  ;;  %s1767_s14 = smov (!%p585_p4, %s584_s14), 7 }
  0x31   : > { %s1317_s23 = sshll.u32 %s1765_s13, 5  ;;  %s592_s24 = sld [smem:[#allocation4 + %s1497_s1]] }
  0x32   : > { %s1634_s30 = scalar_lea.vmem %s1736_s7, %s1317_s23  ;;  %s602_s29 = sld [smem:[#allocation4 + %s1497_s1]] }
  0x33   : > { %s1644_s18 = scalar_lea.vmem %s1740_s11, %s1275_s16  ;;  %s622_s20 = sld [smem:[#allocation5 + %s1497_s1]] }
  0x35   : > { %s1622_s17 = scalar_lea.vmem %s1752_s5, %s1316_s0  ;;  %s590_s0 = scalar_lea.vmem %s1737_s8, %s1767_s14 }
  0x37   : > { %p593_p5 = scmp.lt.s32.totalorder %s592_s24, 7 }
  0x38   : > { %p603_p6 = scmp.lt.s32.totalorder %s602_s29, 7 }
  0x39   : > { %s1769_s24 = smov (!%p593_p5, %s592_s24), 7  ;;  %p1286_p7 = scmp.le.s32.totalorder %s622_s20, 0 }
  0x3a   : > { %s1318_s13 = sshll.u32 %s1769_s24, 6  ;;  %s1771_s29 = smov (!%p603_p6, %s602_s29), 7 }
  0x3b   : > { %s1650_s2 = scalar_lea.vmem %s1738_s9, %s1318_s13  ;;  %s605_s28 = scalar_lea.vmem %s1739_s10, %s1771_s29 }
  0x3c   : > { %626 = sbr.rel (%p1286_p7) target bundleno = 547 (0x223), region = 64  ;;  %s1753_s26 = scalar_lea.vmem (!%p1286_p7), %s1735_s6, %s1763_s12 }
  0x41   : > { %v1423_v1 = vld [vmem:[%s1622_s17 + $0x18] sm:$0xff]   ;;  %v1424_v2 = vld [vmem:[%s1622_s17 + $0x10] sm:$0xff]   ;;  %v1510_v3 = vmov 0   ;;  %v1427_v4 = vld [vmem:[%s1605_s19] sm:$0xff]   ;;  %vm977_vm0 = vcmask 523264  }
  0x42   : > { %1421 = vset.pattern.permute.xlu0 %v1510_v3  ;;  %1422 = vset.pattern.permute.xlu1 %v1510_v3  ;;  %v1425_v5 = vld [vmem:[%s1622_s17 + $0x8] sm:$0xff]   ;;  %v631_v6 = vld [vmem:[%s1610_s22] sm:$0xff]  ;;  %v633_v7 = vld [vmem:[%s1610_s22 + $0x10] sm:$0xff] }
  0x43   : > { %1341 = vmatprep.subr.bf16.mxu1 %v1423_v1  ;;  %1349 = vmatprep.mubr.bf16.mxu1 %v1427_v4  ;;  %v632_v8 = vld [vmem:[%s1610_s22 + $0x8] sm:$0xff]  ;;  %v634_v9 = vld [vmem:[%s1610_s22 + $0x18] sm:$0xff]  ;;  %v1426_v11 = vld [vmem:[%s1622_s17] sm:$0xff]  }
  0x44   : > { %1342 = vmatpush3.bf16.xpose.msra.mxu1 %v1423_v1  ;;  %815 = vperm.xlu0 %1421, %v631_v6   ;;  %v1433_v10 = vld [vmem:[%s1650_s2 + $0x38] sm:$0xff]   ;;  %v1434_v12 = vld [vmem:[%s1650_s2 + $0x30] sm:$0xff]   ;;  %v635_v13 = vld [vmem:[%s1615_s25] sm:$0xff] }
  0x45   : > { %1343 = vmatprep.subr.bf16.mxu1 %v1424_v2  ;;  %825 = vperm.xlu1 %1422, %v633_v7   ;;  %v1006_v14 = vsel %vm977_vm0, %v1433_v10, 0  ;;  %v636_v15 = vld [vmem:[%s1615_s25 + $0x8] sm:$0xff]  ;;  %v637_v16 = vld [vmem:[%s1615_s25 + $0x10] sm:$0xff]  ;;  %v638_v17 = vld [vmem:[%s1615_s25 + $0x18] sm:$0xff]  ;;  %v1003_v18 = vsel %vm977_vm0, %v1434_v12, 0 }
  0x46   : > { %1385 = vmatprep.subr.msk.bf16.mxu0 %vm977_vm0, %v1433_v10  ;;  %v1429_v19 = vld [vmem:[%s1634_s30 + $0x18] sm:$0xff]   ;;  %v1428_v20 = vld [vmem:[%s1605_s19 + $0x8] sm:$0xff]   ;;  %v1430_v21 = vld [vmem:[%s1634_s30 + $0x10] sm:$0xff]  }
  0x47   : > { %1366 = vmatpush3.bf16.xpose.msra.mxu0 %v1006_v14  ;;  %v1431_v22 = vld [vmem:[%s1634_s30 + $0x8] sm:$0xff]   ;;  %v1432_v23 = vld [vmem:[%s1634_s30] sm:$0xff]   ;;  %v1437_v28 = vld [vmem:[%s1650_s2 + $0x18] sm:$0xff]  }
  0x48   : > { %820 = vperm.xlu0 %1421, %v632_v8   ;;  %1386 = vmatprep.subr.msk.bf16.mxu0 %vm977_vm0, %v1434_v12  ;;  %v1435_v24 = vld [vmem:[%s1650_s2 + $0x28] sm:$0xff]   ;;  %v1436_v26 = vld [vmem:[%s1650_s2 + $0x20] sm:$0xff]   ;;  %v994_v29 = vsel %vm977_vm0, %v1437_v28, 0  ;;  %v1438_v30 = vld [vmem:[%s1650_s2 + $0x10] sm:$0xff]  }
  0x49   : > { %830 = vperm.xlu1 %1422, %v634_v9   ;;  %v1000_v25 = vsel %vm977_vm0, %v1435_v24, 0  ;;  %v997_v27 = vsel %vm977_vm0, %v1436_v26, 0  ;;  %v991_v31 = vsel %vm977_vm0, %v1438_v30, 0  ;;  %v1439_v32 = vld [vmem:[%s1650_s2 + $0x8] sm:$0xff]   ;;  %v1440_v34 = vld [vmem:[%s1650_s2] sm:$0xff]  }
  0x4a   : > { %v988_v33 = vsel %vm977_vm0, %v1439_v32, 0  ;;  %v985_v35 = vsel %vm977_vm0, %v1440_v34, 0  ;;  %v1297_v39 = vld [vmem:[%s1753_s26] ss:$0 sm:$0xff] }
  0x4b   : > { %v1298_v12 = vld [vmem:[%s590_s0] ss:$0 sm:$0xff] }
  0x4c   : > { %1344 = vmatpush3.bf16.xpose.msra.mxu1 %v1424_v2  ;;  %897 = vperm.xlu0 %1421, %v635_v13  }
  0x4d   : > { %1345 = vmatprep.subr.bf16.mxu1 %v1425_v5  ;;  %902 = vperm.xlu1 %1422, %v636_v15  }
  0x4f   : > { %1368 = vmatpush3.bf16.xpose.msra.mxu0 %v1003_v18 }
  0x50   : > { %907 = vperm.xlu0 %1421, %v637_v16   ;;  %1387 = vmatprep.subr.msk.bf16.mxu0 %vm977_vm0, %v1435_v24 }
  0x51   : > { %912 = vperm.xlu1 %1422, %v638_v17  }
  0x54   : > { %1346 = vmatpush3.bf16.xpose.msra.mxu1 %v1425_v5 }
  0x55   : > { %1347 = vmatprep.subr.bf16.mxu1 %v1426_v11 }
  0x57   : > { %1370 = vmatpush3.bf16.xpose.msra.mxu0 %v1000_v25 }
  0x58   : > { %1388 = vmatprep.subr.msk.bf16.mxu0 %vm977_vm0, %v1436_v26 }
  0x5c   : > { %1348 = vmatpush3.bf16.xpose.msra.mxu1 %v1426_v11 }
  0x5d   : > { %1353 = vmatprep.subr.bf16.mxu1 %v1429_v19 }
  0x5f   : > { %1372 = vmatpush3.bf16.xpose.msra.mxu0 %v997_v27 }
  0x60   : > { %1389 = vmatprep.subr.msk.bf16.mxu0 %vm977_vm0, %v1437_v28 }
  0x63   : > { %1350 = vmatmul.mubr.bf16.vlgmr.msra.gmra.mxu1 %v1428_v20 }
  0x64   : > { %1354 = vmatpush3.bf16.xpose.msra.mxu1 %v1429_v19  ;;  %1361 = vmatprep.mubr.bf16.mxu1 %v1427_v4 }
  0x65   : > { %1355 = vmatprep.subr.bf16.mxu1 %v1430_v21 }
  0x67   : > { %1374 = vmatpush3.bf16.xpose.msra.mxu0 %v994_v29 }
  0x68   : > { %1390 = vmatprep.subr.msk.bf16.mxu0 %vm977_vm0, %v1438_v30 }
  0x6c   : > { %1356 = vmatpush3.bf16.xpose.msra.mxu1 %v1430_v21 }
  0x6d   : > { %1357 = vmatprep.subr.bf16.mxu1 %v1431_v22 }
  0x6f   : > { %1376 = vmatpush3.bf16.xpose.msra.mxu0 %v991_v31 }
  0x70   : > { %1391 = vmatprep.subr.msk.bf16.mxu0 %vm977_vm0, %v1439_v32 }
  0x74   : > { %1358 = vmatpush3.bf16.xpose.msra.mxu1 %v1431_v22 }
  0x75   : > { %1359 = vmatprep.subr.bf16.mxu1 %v1432_v23 }
  0x77   : > { %1378 = vmatpush3.bf16.xpose.msra.mxu0 %v988_v33 }
  0x78   : > { %1392 = vmatprep.subr.msk.bf16.mxu0 %vm977_vm0, %v1440_v34 }
  0x7c   : > { %1360 = vmatpush3.bf16.xpose.msra.mxu1 %v1432_v23 }
  0x7f   : > { %1380 = vmatpush3.bf16.xpose.msra.mxu0 %v985_v35 }
  0x83   : > { %1362 = vmatmul.mubr.bf16.vlgmr.msra.gmra.mxu1 %v1428_v20 }
  0xbf   : > { %v816_v37 = vpop.permute.xlu0 %815 }
  0xc0   : > { %v826_v36 = vpop.permute.xlu1 %825 }
  0xc3   : > { %v821_v49 = vpop.permute.xlu0 %820 }
  0xc4   : > { %v831_v44 = vpop.permute.xlu1 %830 }
  0xc7   : > { %v898_v16 = vpop.permute.xlu0 %897 }
  0xc8   : > { %v903_v10 = vpop.permute.xlu1 %902 }
  0xcb   : > { %v908_v30 = vpop.permute.xlu0 %907 }
  0xcc   : > { %v913_v27 = vpop.permute.xlu1 %912 }
 0x123   : > { %v1351_v38 = vpop.f32.mrf.mxu1 }
 0x124   : > { %v835_v40 = vmul.f32 %v1351_v38, %v826_v36  ;;  %v1059_v38 = vld [vmem:[#allocation2 + $0x18] sm:$0xff] }
 0x125   : > { %v725_v41 = vpop.f32.mrf.mxu1 }
 0x126   : > { %v846_v42 = vmul.f32 %v1297_v39, %v835_v40  ;;  %v833_v43 = vmul.f32 %v816_v37, %v725_v41  ;;  %v1057_v41 = vld [vmem:[#allocation2 + $0x10] sm:$0xff] }
 0x127   : > { %v1352_v45 = vpop.f32.mrf.mxu1 }
 0x128   : > { %v1301_v46 = vmul.f32 -1.442695, %v846_v42  ;;  %v844_v47 = vmul.f32 %v1297_v39, %v833_v43  ;;  %v836_v48 = vmul.f32 %v1352_v45, %v831_v44  ;;  %v1060_v45 = vld [vmem:[#allocation2 + $0x8] sm:$0xff] }
 0x129   : > { %v728_v50 = vpop.f32.mrf.mxu1 }
 0x12a   : > { %1441 = vpow2.f32 %v1301_v46  ;;  %v1299_v51 = vmul.f32 -1.442695, %v844_v47  ;;  %v847_v52 = vmul.f32 %v1297_v39, %v836_v48  ;;  %v834_v53 = vmul.f32 %v821_v49, %v728_v50 }
 0x12c   : > { %1443 = vpow2.f32 %v1299_v51  ;;  %v1302_v54 = vmul.f32 -1.442695, %v847_v52  ;;  %v845_v55 = vmul.f32 %v1297_v39, %v834_v53 }
 0x12e   : > { %1445 = vpow2.f32 %v1302_v54  ;;  %v1300_v56 = vmul.f32 -1.442695, %v845_v55 }
 0x130   : > { %1447 = vpow2.f32 %v1300_v56 }
 0x137   : > { %v1442_v57 = vpop.eup %1441 }
 0x138   : > { %v877_v58 = vadd.f32 1.0, %v1442_v57 }
 0x139   : > { %v1444_v59 = vpop.eup %1443 }
 0x13a   : > { %v875_v60 = vadd.f32 1.0, %v1444_v59  ;;  %1449 = vrcp.f32 %v877_v58 }
 0x13b   : > { %v1446_v61 = vpop.eup %1445 }
 0x13c   : > { %1451 = vrcp.f32 %v875_v60  ;;  %v878_v62 = vadd.f32 1.0, %v1446_v61 }
 0x13d   : > { %v1448_v63 = vpop.eup %1447 }
 0x13e   : > { %1453 = vrcp.f32 %v878_v62  ;;  %v876_v0 = vadd.f32 1.0, %v1448_v63 }
 0x140   : > { %1455 = vrcp.f32 %v876_v0 }
 0x143   : > { %v1363_v1 = vpop.f32.mrf.mxu1 }
 0x144   : > { %v850_v8 = vmul.f32 %v1363_v1, %v826_v36  ;;  %v1313_v36 = vld [vmem:[%s605_s28] ss:$0 sm:$0xff] }
 0x145   : > { %v798_v2 = vpop.f32.mrf.mxu1 }
 0x146   : > { %v848_v5 = vmul.f32 %v816_v37, %v798_v2  ;;  %v861_v21 = vmul.f32 %v1298_v12, %v850_v8 }
 0x147   : > { %v1364_v3 = vpop.f32.mrf.mxu1  ;;  %v1450_v4 = vpop.eup %1449 }
 0x148   : > { %v851_v6 = vmul.f32 %v1364_v3, %v831_v44  ;;  %v889_v15 = vmul.f32 %v1450_v4, %v846_v42  ;;  %v859_v18 = vmul.f32 %v1298_v12, %v848_v5 }
 0x149   : > { %v1452_v7 = vpop.eup %1451  ;;  %v801_v9 = vpop.f32.mrf.mxu1 }
 0x14a   : > { %v887_v11 = vmul.f32 %v1452_v7, %v844_v47  ;;  %v849_v13 = vmul.f32 %v821_v49, %v801_v9  ;;  %v862_v19 = vmul.f32 %v1298_v12, %v851_v6  ;;  %v893_v26 = vmul.f32 %v889_v15, %v861_v21  ;;  %v1058_v49 = vld [vmem:[#allocation2] sm:$0xff] }
 0x14b   : > { %v1454_v14 = vpop.eup %1453 }
 0x14c   : > { %v890_v17 = vmul.f32 %v1454_v14, %v847_v52  ;;  %v891_v23 = vmul.f32 %v887_v11, %v859_v18  ;;  %v860_v25 = vmul.f32 %v1298_v12, %v849_v13  ;;  %v917_v33 = vmul.f32 %v908_v30, %v893_v26 }
 0x14d   : > { %v1456_v20 = vpop.eup %1455 }
 0x14e   : > { %v888_v22 = vmul.f32 %v1456_v20, %v845_v55  ;;  %v894_v24 = vmul.f32 %v890_v17, %v862_v19  ;;  %v915_v31 = vmul.f32 %v898_v16, %v891_v23 }
 0x150   : > { %v892_v28 = vmul.f32 %v888_v22, %v860_v25  ;;  %v918_v29 = vmul.f32 %v913_v27, %v894_v24 }
 0x152   : > { %v916_v32 = vmul.f32 %v903_v10, %v892_v28  ;;  %v936_v35 = vpack.c.bf16 %v918_v29, %v917_v33 }
 0x154   : > { %v935_v34 = vpack.c.bf16 %v916_v32, %v915_v31 }
 0x156   : > { %1381 = vmatprep.mubr.msk.bf16.mxu0 %vm977_vm0, %v935_v34 }
 0x157   : > { %1382 = vmatmul.mubr.msk.bf16.vlgmr.msra.gmra.mxu0 %vm977_vm0, %v936_v35 }
 0x217   : > { %v1383_v37 = vpop.f32.mrf.mxu0 }
 0x218   : > { %v1070_v39 = vmul.f32 %v1383_v37, %v1313_v36 }
 0x219   : > { %v1042_v40 = vpop.f32.mrf.mxu0 }
 0x21a   : > { %v1074_v42 = vadd.f32 %v1070_v39, %v1059_v38  ;;  %v1068_v43 = vmul.f32 %v1313_v36, %v1042_v40 }
 0x21b   : > { %v1384_v44 = vpop.f32.mrf.mxu0 }
 0x21c   : > { %1078 = vst [vmem:[#allocation2 + $0x18] sm:$0xff] %v1074_v42  ;;  %v1072_v46 = vadd.f32 %v1068_v43, %v1057_v41  ;;  %v1071_v47 = vmul.f32 %v1384_v44, %v1313_v36 }
 0x21d   : > { %v1045_v48 = vpop.f32.mrf.mxu0 }
 0x21e   : > { %1076 = vst [vmem:[#allocation2 + $0x10] sm:$0xff] %v1072_v46  ;;  %v1075_v50 = vadd.f32 %v1071_v47, %v1060_v45  ;;  %v1069_v51 = vmul.f32 %v1313_v36, %v1045_v48 }
 0x220   : > { %1079 = vst [vmem:[#allocation2 + $0x8] sm:$0xff] %v1075_v50  ;;  %v1073_v52 = vadd.f32 %v1069_v51, %v1058_v49 }
 0x222   : > { %1077 = vst [vmem:[#allocation2] sm:$0xff] %v1073_v52 }
 0x223 PF: > { %v1085_v55 = vld [vmem:[#allocation2 + $0x18] sm:$0xff] }
 0x224   : > { %1089 = vst [vmem:[%s1644_s18 + $0x10] sm:$0xff] %v1085_v55 }
 0x225   : > { %v1083_v53 = vld [vmem:[#allocation2 + $0x10] sm:$0xff] }
 0x226   : > { %1087 = vst [vmem:[%s1644_s18] sm:$0xff] %v1083_v53 }
 0x227   : > { %v1086_v56 = vld [vmem:[#allocation2 + $0x8] sm:$0xff] }
 0x228   : > { %1090 = vst [vmem:[%s1644_s18 + $0x18] sm:$0xff] %v1086_v56 }
 0x229   : > { %v1084_v54 = vld [vmem:[#allocation2] sm:$0xff] }
 0x22a   : > { %1088 = vst [vmem:[%s1644_s18 + $0x8] sm:$0xff] %v1084_v54 }
 0x22b PF: > { %s31_s27 = sadd.s32 1, %s1505_s27   ;;  %s1754_s1 = sld [smem:[#allocation7_spill]] }
 0x22c   : > { %p28_p8 = scmp.ge.s32.totalorder %s31_s27, 11   ;;  %s1755_s26 = sld [smem:[#allocation8_spill]] }
 0x22e   :  { %30 = sbr.rel (!%p28_p8) target bundleno = 29 (0x1d), region = 122 }

</bundles_post_ra>
